<compile_context>
chip_gen: v7x
topology: tpu7x:2x2x1
jax: 0.10.0
libtpu: 0.0.40
codegen_flags: <defaults>
</compile_context>

<pallas_src>
import functools

import jax
import jax.numpy as jnp
from jax.experimental import pallas as pl
from jax.experimental.pallas import tpu as pltpu

LN_EPS = 1e-5  # PyTorch LayerNorm default


def _cfconv_s2v_kernel(s_ref, wgt_ref, w_ref, b_ref, g_ref, beta_ref,
                       out_ref, h_ref, *, h_lane_aligned):
  """Grid: (batch blocks, output-node row blocks).

  s_ref    : (TB, Np, H)      node scalars (full node axis, resident over rows)
  wgt_ref  : (TB, 3, TR, Np)  pre-masked edge weights (mask * ev), axis-major
  w_ref    : (H, H)           Linear weight, (in, out) orientation (x @ W)
  b/g/beta : (1, H)           Linear bias / LN gamma / LN beta (f32)
  out_ref  : (TB, TR, 3H)     out[., n, d*H:(d+1)*H] == v[., n, d, :]
  h_ref    : (TB, Np, H)      VMEM scratch caching SiLU(LN(Linear(s)))
  """
  H = s_ref.shape[-1]

  # ---- lin1: Linear -> LayerNorm -> SiLU, once per batch block ----
  @pl.when(pl.program_id(1) == 0)
  def _():
    x = s_ref[...].astype(jnp.float32)
    h = jax.lax.dot_general(x, w_ref[...].astype(jnp.float32),
                            (((2,), (0,)), ((), ())),
                            preferred_element_type=jnp.float32)   # (TB, Np, H)
    h = h + b_ref[...]
    mu = jnp.mean(h, axis=-1, keepdims=True)
    var = jnp.mean(h * h, axis=-1, keepdims=True) - mu * mu       # one-pass LN
    h = (h - mu) * jax.lax.rsqrt(var + LN_EPS)
    h = h * g_ref[...] + beta_ref[...]
    h = h * jax.nn.sigmoid(h)                                     # SiLU (EUP)
    h_ref[...] = h.astype(h_ref.dtype)                            # bf16/f32 MXU input

  # ---- s2v: one batched MXU matmul (3*TR, Np) @ (Np, H) per batch element ----
  rb = jax.lax.dot_general(wgt_ref[...], h_ref[...],
                           (((3,), (1,)), ((0,), (0,))),
                           preferred_element_type=jnp.float32)    # (TB, 3, TR, H)

  if h_lane_aligned:
    # H multiple of 128: lane-aligned full-width column stores (unmasked vst).
    for d in range(3):
      out_ref[:, :, d * H:(d + 1) * H] = rb[:, d].astype(out_ref.dtype)
  else:
    # Small H: build one lane-dense slab, single full-block store.
    slab = jnp.concatenate([rb[:, 0], rb[:, 1], rb[:, 2]], axis=-1)
    out_ref[...] = slab.astype(out_ref.dtype)


def _device_budgets():
  """(block footprint budget, vmem_limit_bytes) sized per TPU generation."""
  try:
    kind = jax.devices()[0].device_kind.lower()
  except Exception:  # pragma: no cover - CPU / interpret fallback
    kind = ""
  if any(t in kind for t in ("v4", "v5", "v6")):   # 128 MiB physical VMEM
    return 40 << 20, 96 << 20
  # v7x (64 MiB physical) or unknown: be conservative.
  return 16 << 20, 40 << 20


def _pick_tiles(B, Np, H, wgt_itm, s_itm, out_itm, budget_bytes):
  """Pick (TB, TR): batch tile and output-node row tile."""

  def footprint(tb, tr):
    blocks = 2 * tb * tr * (3 * Np * wgt_itm + 3 * H * out_itm)   # wgt+out, dbl buf
    blocks += 2 * tb * Np * H * s_itm                             # s block, dbl buf
    scratch = tb * Np * H * wgt_itm                               # cached activations
    interm = tb * (Np * H + 6 * tr * H) * 4                       # f32 temporaries
    fixed = H * H * s_itm + 3 * H * 4
    return blocks + scratch + interm + fixed

  # Prefer TR == Np; grow TB over divisors of B, capped so the parallel batch
  # axis keeps >= 2 grid steps (megacore sharding on 2-TC chips).
  tb_cap = B // 2 if B >= 2 else 1
  tb_cap = max(1, min(tb_cap, 16))
  tb = 0
  for cand in range(1, tb_cap + 1):
    if B % cand == 0 and footprint(cand, Np) <= budget_bytes:
      tb = cand
  if tb:
    return tb, Np

  # Even one batch element over budget: row-block the output-node axis
  # (lin1 activations are cached in scratch, so no redundant compute).
  row_divs = [d for d in range(8, Np, 8) if Np % d == 0]
  for tr in sorted(row_divs, reverse=True):
    if footprint(1, tr) <= budget_bytes:
      return 1, tr
  return 1, (row_divs[0] if row_divs else Np)


@functools.partial(jax.jit, static_argnames=("mxu_dtype", "vmem_budget_bytes"))
def cfconv_s2v(s, ev, mask, w, bias, gamma, beta, *, mxu_dtype="bfloat16",
               vmem_budget_bytes=None):
  """CFConvS2V forward.

  s     : (B, N, H)
  ev    : (B, N, N, 3)
  mask  : (B, N, N, 1)
  w     : (H, H)  PyTorch nn.Linear weight, (out_features, in_features)
  bias, gamma, beta : (H,)
  mxu_dtype : dtype for the s2v matmul inputs ("bfloat16" default; accumulation
              and LN/SiLU math stay f32). Pass "float32"/None for exact mode.
  returns v : (B, N, 3, H)
  """
  B, N, H = s.shape
  cdt = jnp.dtype(mxu_dtype) if mxu_dtype is not None else s.dtype
  odt = s.dtype

  # Pad the node axis to a sublane multiple; padded mask entries are zero so
  # padded nodes contribute nothing, and padded output rows are sliced off.
  pad = (-N) % 8
  if pad:
    s = jnp.pad(s, ((0, 0), (0, pad), (0, 0)))
    ev = jnp.pad(ev, ((0, 0), (0, pad), (0, pad), (0, 0)))
    mask = jnp.pad(mask, ((0, 0), (0, pad), (0, pad), (0, 0)))
  Np = N + pad

  # Pre-fuse mask*ev into an axis-major, lane-dense LHS (B, 3, Np, Np) in the
  # MXU dtype (bf16 by default -> halves HBM bytes of the dominant tensor).
  # TODO(synk): have the upstream producer emit ev already axis-major to avoid
  # this extra HBM round trip of the largest tensor.
  wgt = (jnp.moveaxis(ev, -1, 1) * mask[..., 0][:, None]).astype(cdt)

  # PyTorch nn.Linear computes x @ W.T with W stored (out, in); pre-transpose.
  w_io = jnp.transpose(w).astype(s.dtype)                         # (in, out)
  bias2 = bias.reshape(1, H).astype(jnp.float32)
  gamma2 = gamma.reshape(1, H).astype(jnp.float32)
  beta2 = beta.reshape(1, H).astype(jnp.float32)

  budget, vmem_limit = _device_budgets()
  if vmem_budget_bytes is not None:
    budget = int(vmem_budget_bytes)
  TB, TR = _pick_tiles(B, Np, H, jnp.dtype(cdt).itemsize,
                       jnp.dtype(s.dtype).itemsize, jnp.dtype(odt).itemsize,
                       budget)
  grid = (B // TB, Np // TR)

  cost = pl.CostEstimate(
      flops=2 * B * Np * H * H + 2 * B * 3 * Np * Np * H,
      transcendentals=B * Np * (H + 1),
      bytes_accessed=(s.size * s.dtype.itemsize
                      + wgt.size * wgt.dtype.itemsize
                      + H * H * s.dtype.itemsize + 3 * H * 4
                      + B * Np * 3 * H * jnp.dtype(odt).itemsize))

  kernel = functools.partial(_cfconv_s2v_kernel,
                             h_lane_aligned=(H % 128 == 0))
  out = pl.pallas_call(
      kernel,
      out_shape=jax.ShapeDtypeStruct((B, Np, 3 * H), odt),
      grid=grid,
      in_specs=[
          pl.BlockSpec((TB, Np, H), lambda b, r: (b, 0, 0)),        # s
          pl.BlockSpec((TB, 3, TR, Np), lambda b, r: (b, 0, r, 0)),  # mask*ev
          pl.BlockSpec((H, H), lambda b, r: (0, 0)),                # W (in, out)
          pl.BlockSpec((1, H), lambda b, r: (0, 0)),                # bias
          pl.BlockSpec((1, H), lambda b, r: (0, 0)),                # gamma
          pl.BlockSpec((1, H), lambda b, r: (0, 0)),                # beta
      ],
      out_specs=pl.BlockSpec((TB, TR, 3 * H), lambda b, r: (b, r, 0)),
      scratch_shapes=[pltpu.VMEM((TB, Np, H), cdt)],
      compiler_params=pltpu.CompilerParams(
          dimension_semantics=("parallel", "arbitrary"),
          vmem_limit_bytes=vmem_limit),
      cost_estimate=cost,
  )(s, wgt, w_io, bias2, gamma2, beta2)

  if pad:
    out = out[:, :N]
  # Contiguous reshape only (no HBM transpose) back to the PyTorch layout.
  return out.reshape(B, N, 3, H)


def cfconv_s2v_reference(s, ev, mask, w, bias, gamma, beta):
  """Pure-JAX reference mirroring the PyTorch forward (w is (out, in))."""
  h = s @ w.T + bias
  mu = h.mean(-1, keepdims=True)
  var = ((h - mu) ** 2).mean(-1, keepdims=True)
  h = (h - mu) / jnp.sqrt(var + LN_EPS) * gamma + beta
  h = h * jax.nn.sigmoid(h)                      # SiLU
  s_b = h[:, None, :, :] * mask                  # (B, N, N, H)
  v = s_b[:, :, :, None, :] * ev[..., None]      # (B, N, N, 3, H)
  return v.sum(axis=2)                           # (B, N, 3, H)


def _make_inputs(key, B, N, H):
  ks, kev, km, kw, kb, kg, kbeta = jax.random.split(key, 7)
  s = jax.random.normal(ks, (B, N, H), dtype=jnp.float32)
  ev = jax.random.normal(kev, (B, N, N, 3), dtype=jnp.float32)
  mask = (jax.random.uniform(km, (B, N, N, 1)) > 0.3).astype(jnp.float32)
  w = jax.random.normal(kw, (H, H), dtype=jnp.float32) * (1.0 / jnp.sqrt(H))
  bias = jax.random.normal(kb, (H,), dtype=jnp.float32) * 0.1
  gamma = 1.0 + 0.1 * jax.random.normal(kg, (H,), dtype=jnp.float32)
  beta = 0.1 * jax.random.normal(kbeta, (H,), dtype=jnp.float32)
  return s, ev, mask, w, bias, gamma, beta


if __name__ == "__main__":
  key = jax.random.PRNGKey(0)
  k1, k2 = jax.random.split(key)

  # --- test 1: exact (f32 MXU) path, small shapes ---
  B, N, H = 2, 16, 32
  s, ev, mask, w, bias, gamma, beta = _make_inputs(k1, B, N, H)
  ref = cfconv_s2v_reference(s, ev, mask, w, bias, gamma, beta)

  out32 = cfconv_s2v(s, ev, mask, w, bias, gamma, beta, mxu_dtype="float32")
  out32 = jax.block_until_ready(out32)
  assert out32.shape == (B, N, 3, H), out32.shape
  assert jnp.allclose(out32, ref, atol=1e-4, rtol=1e-4), (
      float(jnp.max(jnp.abs(out32 - ref))))

  # --- test 2: default bf16 s2v path (relaxed tolerance) ---
  out_bf = cfconv_s2v(s, ev, mask, w, bias, gamma, beta)
  out_bf = jax.block_until_ready(out_bf)
  assert out_bf.shape == (B, N, 3, H), out_bf.shape
  assert jnp.allclose(out_bf, ref, atol=7.5e-2, rtol=5e-2), (
      float(jnp.max(jnp.abs(out_bf - ref))))

  # --- test 3: force the large-N row-blocking fallback with a tiny budget ---
  B2, N2, H2 = 1, 64, 32
  s2, ev2, mask2, w2, bias2, gamma2, beta2 = _make_inputs(k2, B2, N2, H2)
  ref2 = cfconv_s2v_reference(s2, ev2, mask2, w2, bias2, gamma2, beta2)
  out2 = cfconv_s2v(s2, ev2, mask2, w2, bias2, gamma2, beta2,
                    mxu_dtype="float32", vmem_budget_bytes=32 * 1024)
  out2 = jax.block_until_ready(out2)
  assert out2.shape == (B2, N2, 3, H2), out2.shape
  assert jnp.allclose(out2, ref2, atol=1e-3, rtol=1e-3), (
      float(jnp.max(jnp.abs(out2 - ref2))))

  print("KERNEL_OK")
</pallas_src>

<mosaic_0001>
module attributes {stable_mosaic.version = 11 : i64} {
  func.func @_cfconv_s2v_kernel(%arg0: i32, %arg1: i32, %arg2: memref<1x16x32xf32, #tpu.memory_space<vmem>>, %arg3: memref<1x3x16x16xf32, #tpu.memory_space<vmem>>, %arg4: memref<32x32xf32, #tpu.memory_space<vmem>>, %arg5: memref<1x32xf32, #tpu.memory_space<vmem>>, %arg6: memref<1x32xf32, #tpu.memory_space<vmem>>, %arg7: memref<1x32xf32, #tpu.memory_space<vmem>>, %arg8: memref<1x16x96xf32, #tpu.memory_space<vmem>>, %arg9: memref<1x16x32xf32, #tpu.memory_space<vmem>>) attributes {dimension_semantics = [#tpu.dimension_semantics<parallel>, #tpu.dimension_semantics<arbitrary>], iteration_bounds = array<i64: 2, 1>, scalar_prefetch = 0 : i64, scratch_operands = 1 : i64, tpu.core_type = #tpu.core_type<tc>, window_params = [{transform_indices = @transform_0, window_bounds = array<i64: 1, 16, 32>}, {transform_indices = @transform_1, window_bounds = array<i64: 1, 3, 16, 16>}, {pipeline_mode = #tpu.pipeline_mode<synchronous>, transform_indices = @transform_2, window_bounds = array<i64: 32, 32>}, {pipeline_mode = #tpu.pipeline_mode<synchronous>, transform_indices = @transform_3, window_bounds = array<i64: 1, 32>}, {pipeline_mode = #tpu.pipeline_mode<synchronous>, transform_indices = @transform_4, window_bounds = array<i64: 1, 32>}, {pipeline_mode = #tpu.pipeline_mode<synchronous>, transform_indices = @transform_5, window_bounds = array<i64: 1, 32>}, {transform_indices = @transform_6, window_bounds = array<i64: 1, 16, 96>}]} {
    %c0_i32 = arith.constant 0 : i32
    %0 = arith.cmpi eq, %arg1, %c0_i32 : i32
    %1 = arith.extui %0 : i1 to i32
    %c0_i32_0 = arith.constant 0 : i32
    %2 = arith.cmpi ne, %1, %c0_i32_0 : i32
    scf.if %2 {
      %c0_10 = arith.constant 0 : index
      %c0_11 = arith.constant 0 : index
      %c0_12 = arith.constant 0 : index
      %14 = vector.load %arg2[%c0_10, %c0_11, %c0_12] : memref<1x16x32xf32, #tpu.memory_space<vmem>>, vector<1x16x32xf32>
      %c0_13 = arith.constant 0 : index
      %c0_14 = arith.constant 0 : index
      %15 = vector.load %arg4[%c0_13, %c0_14] : memref<32x32xf32, #tpu.memory_space<vmem>>, vector<32x32xf32>
      %cst_15 = arith.constant dense<0.000000e+00> : vector<1x16x32xf32>
      %16 = tpu.matmul %14, %15, %cst_15 {dimension_numbers = #tpu.dot_dimension_numbers<[2], [0], [0, 1], [1], [0, 0, 0, 1, 1, 1], [], []>} : vector<1x16x32xf32>, vector<32x32xf32>, vector<1x16x32xf32> -> vector<1x16x32xf32>
      %c0_16 = arith.constant 0 : index
      %c0_17 = arith.constant 0 : index
      %17 = vector.load %arg5[%c0_16, %c0_17] : memref<1x32xf32, #tpu.memory_space<vmem>>, vector<1x32xf32>
      %18 = vector.shape_cast %17 : vector<1x32xf32> to vector<1x1x32xf32>
      %19 = vector.broadcast %18 : vector<1x1x32xf32> to vector<1x16x32xf32>
      %20 = arith.addf %16, %19 : vector<1x16x32xf32>
      %cst_18 = arith.constant dense<0.000000e+00> : vector<1x16xf32>
      %21 = vector.multi_reduction <add>, %20, %cst_18 [2] : vector<1x16x32xf32> to vector<1x16xf32>
      %22 = vector.shape_cast %21 : vector<1x16xf32> to vector<1x16x1xf32>
      %cst_19 = arith.constant 3.200000e+01 : f32
      %23 = vector.broadcast %cst_19 : f32 to vector<1x16x1xf32>
      %24 = arith.divf %22, %23 : vector<1x16x1xf32>
      %25 = arith.mulf %20, %20 : vector<1x16x32xf32>
      %cst_20 = arith.constant dense<0.000000e+00> : vector<1x16xf32>
      %26 = vector.multi_reduction <add>, %25, %cst_20 [2] : vector<1x16x32xf32> to vector<1x16xf32>
      %27 = vector.shape_cast %26 : vector<1x16xf32> to vector<1x16x1xf32>
      %cst_21 = arith.constant 3.200000e+01 : f32
      %28 = vector.broadcast %cst_21 : f32 to vector<1x16x1xf32>
      %29 = arith.divf %27, %28 : vector<1x16x1xf32>
      %30 = arith.mulf %24, %24 : vector<1x16x1xf32>
      %31 = arith.subf %29, %30 : vector<1x16x1xf32>
      %32 = vector.broadcast %24 : vector<1x16x1xf32> to vector<1x16x32xf32>
      %33 = arith.subf %20, %32 : vector<1x16x32xf32>
      %cst_22 = arith.constant 9.99999974E-6 : f32
      %34 = vector.broadcast %cst_22 : f32 to vector<1x16x1xf32>
      %35 = arith.addf %31, %34 : vector<1x16x1xf32>
      %36 = math.rsqrt %35 : vector<1x16x1xf32>
      %37 = vector.broadcast %36 : vector<1x16x1xf32> to vector<1x16x32xf32>
      %38 = arith.mulf %33, %37 : vector<1x16x32xf32>
      %c0_23 = arith.constant 0 : index
      %c0_24 = arith.constant 0 : index
      %39 = vector.load %arg6[%c0_23, %c0_24] : memref<1x32xf32, #tpu.memory_space<vmem>>, vector<1x32xf32>
      %40 = vector.shape_cast %39 : vector<1x32xf32> to vector<1x1x32xf32>
      %41 = vector.broadcast %40 : vector<1x1x32xf32> to vector<1x16x32xf32>
      %42 = arith.mulf %38, %41 : vector<1x16x32xf32>
      %c0_25 = arith.constant 0 : index
      %c0_26 = arith.constant 0 : index
      %43 = vector.load %arg7[%c0_25, %c0_26] : memref<1x32xf32, #tpu.memory_space<vmem>>, vector<1x32xf32>
      %44 = vector.shape_cast %43 : vector<1x32xf32> to vector<1x1x32xf32>
      %45 = vector.broadcast %44 : vector<1x1x32xf32> to vector<1x16x32xf32>
      %46 = arith.addf %42, %45 : vector<1x16x32xf32>
      %47 = arith.negf %46 : vector<1x16x32xf32>
      %48 = math.exp %47 : vector<1x16x32xf32>
      %cst_27 = arith.constant 1.000000e+00 : f32
      %49 = vector.broadcast %cst_27 : f32 to vector<1x16x32xf32>
      %50 = arith.addf %49, %48 : vector<1x16x32xf32>
      %51 = arith.divf %49, %50 : vector<1x16x32xf32>
      %52 = arith.mulf %46, %51 : vector<1x16x32xf32>
      %c0_28 = arith.constant 0 : index
      %c0_29 = arith.constant 0 : index
      %c0_30 = arith.constant 0 : index
      %53 = vector.load %arg9[%c0_28, %c0_29, %c0_30] : memref<1x16x32xf32, #tpu.memory_space<vmem>>, vector<1x16x32xf32>
      tpu.vector_store %arg9[%c0_28, %c0_29, %c0_30], %52 {strides = array<i32>} : memref<1x16x32xf32, #tpu.memory_space<vmem>>, vector<1x16x32xf32>,
    } else {
    }
    %c0 = arith.constant 0 : index
    %c0_1 = arith.constant 0 : index
    %c0_2 = arith.constant 0 : index
    %c0_3 = arith.constant 0 : index
    %3 = vector.load %arg3[%c0, %c0_1, %c0_2, %c0_3] : memref<1x3x16x16xf32, #tpu.memory_space<vmem>>, vector<1x3x16x16xf32>
    %c0_4 = arith.constant 0 : index
    %c0_5 = arith.constant 0 : index
    %c0_6 = arith.constant 0 : index
    %4 = vector.load %arg9[%c0_4, %c0_5, %c0_6] : memref<1x16x32xf32, #tpu.memory_space<vmem>>, vector<1x16x32xf32>
    %cst = arith.constant dense<0.000000e+00> : vector<1x3x16x32xf32>
    %5 = tpu.matmul %3, %4, %cst {dimension_numbers = #tpu.dot_dimension_numbers<[3], [1], [1, 2], [2], [0, 0, 0, 1, 0, 2, 1, 2], [0], [0]>} : vector<1x3x16x16xf32>, vector<1x16x32xf32>, vector<1x3x16x32xf32> -> vector<1x3x16x32xf32>
    %6 = vector.extract_strided_slice %5 {offsets = [0, 0, 0, 0], sizes = [1, 1, 16, 32], strides = [1, 1, 1, 1]} : vector<1x3x16x32xf32> to vector<1x1x16x32xf32>
    %7 = vector.shape_cast %6 : vector<1x1x16x32xf32> to vector<1x16x32xf32>
    %8 = vector.extract_strided_slice %5 {offsets = [0, 1, 0, 0], sizes = [1, 1, 16, 32], strides = [1, 1, 1, 1]} : vector<1x3x16x32xf32> to vector<1x1x16x32xf32>
    %9 = vector.shape_cast %8 : vector<1x1x16x32xf32> to vector<1x16x32xf32>
    %10 = vector.extract_strided_slice %5 {offsets = [0, 2, 0, 0], sizes = [1, 1, 16, 32], strides = [1, 1, 1, 1]} : vector<1x3x16x32xf32> to vector<1x1x16x32xf32>
    %11 = vector.shape_cast %10 : vector<1x1x16x32xf32> to vector<1x16x32xf32>
    %12 = tpu.concatenate %7, %9, %11 in 2 : vector<1x16x32xf32>, vector<1x16x32xf32>, vector<1x16x32xf32> -> vector<1x16x96xf32>
    %c0_7 = arith.constant 0 : index
    %c0_8 = arith.constant 0 : index
    %c0_9 = arith.constant 0 : index
    %13 = vector.load %arg8[%c0_7, %c0_8, %c0_9] : memref<1x16x96xf32, #tpu.memory_space<vmem>>, vector<1x16x96xf32>
    tpu.vector_store %arg8[%c0_7, %c0_8, %c0_9], %12 {strides = array<i32>} : memref<1x16x96xf32, #tpu.memory_space<vmem>>, vector<1x16x96xf32>,
    return
  }
  func.func @transform_0(%arg0: i32, %arg1: i32) -> (i32, i32, i32) {
    %c0_i32 = arith.constant 0 : i32
    %c0_i32_0 = arith.constant 0 : i32
    %c0_i32_1 = arith.constant 0 : i32
    return %arg0, %c0_i32, %c0_i32_0 : i32, i32, i32
  }
  func.func @transform_1(%arg0: i32, %arg1: i32) -> (i32, i32, i32, i32) {
    %c0_i32 = arith.constant 0 : i32
    %c0_i32_0 = arith.constant 0 : i32
    %c0_i32_1 = arith.constant 0 : i32
    return %arg0, %c0_i32, %arg1, %c0_i32_0 : i32, i32, i32, i32
  }
  func.func @transform_2(%arg0: i32, %arg1: i32) -> (i32, i32) {
    %c0_i32 = arith.constant 0 : i32
    %c0_i32_0 = arith.constant 0 : i32
    %c0_i32_1 = arith.constant 0 : i32
    return %c0_i32, %c0_i32_0 : i32, i32
  }
  func.func @transform_3(%arg0: i32, %arg1: i32) -> (i32, i32) {
    %c0_i32 = arith.constant 0 : i32
    %c0_i32_0 = arith.constant 0 : i32
    %c0_i32_1 = arith.constant 0 : i32
    return %c0_i32, %c0_i32_0 : i32, i32
  }
  func.func @transform_4(%arg0: i32, %arg1: i32) -> (i32, i32) {
    %c0_i32 = arith.constant 0 : i32
    %c0_i32_0 = arith.constant 0 : i32
    %c0_i32_1 = arith.constant 0 : i32
    return %c0_i32, %c0_i32_0 : i32, i32
  }
  func.func @transform_5(%arg0: i32, %arg1: i32) -> (i32, i32) {
    %c0_i32 = arith.constant 0 : i32
    %c0_i32_0 = arith.constant 0 : i32
    %c0_i32_1 = arith.constant 0 : i32
    return %c0_i32, %c0_i32_0 : i32, i32
  }
  func.func @transform_6(%arg0: i32, %arg1: i32) -> (i32, i32, i32) {
    %c0_i32 = arith.constant 0 : i32
    %c0_i32_0 = arith.constant 0 : i32
    return %arg0, %arg1, %c0_i32 : i32, i32, i32
  }
}

</mosaic_0001>

<bundles_post_ra>
// kernel: cfconv_s2v.1
= control target key start
LH: loop header
LB: loop body
LE: loop exit
PB: predicated region body
PF: predicated region fallthrough
CT: control target
= control target key end

     0   :  { %s898_s21 = smov 0   ;;  %s900_s22 = smov 0   ;;  %s987_s0 = inlined_call_operand.vmem [shape: f32[2,16,32], index: 0, kind: input, shape index: {}]   ;;  %s988_s1 = inlined_call_operand.vmem [shape: f32[2,3,16,16], index: 1, kind: input, shape index: {}]   ;;  %s989_s2 = inlined_call_operand.vmem [shape: f32[32,32], index: 2, kind: input, shape index: {}]   ;;  %s990_s3 = inlined_call_operand.vmem [shape: f32[1,32], index: 3, kind: input, shape index: {}]   ;;  %s991_s4 = inlined_call_operand.vmem [shape: f32[1,32], index: 4, kind: input, shape index: {}]   ;;  %s992_s5 = inlined_call_operand.vmem [shape: f32[1,32], index: 5, kind: input, shape index: {}]   ;;  %s993_s6 = inlined_call_operand.vmem [shape: f32[2,16,96], index: 6, kind: output, shape index: {}]  }
   0x1   :  { %s902_s23 = smov 0  }
   0x2 LB: > { %s28_s24 = sadd.s32 1, %s855_s22  ;;  %p725_p0 = scmp.ge.s32.totalorder %s859_s23, 1  ;;  %s859_s23 = sphi %s902_s23, %s16_s23   ;;  %s855_s22 = sphi %s900_s22, %s995_s22   ;;  %s851_s21 = sphi %s898_s21, %s994_s21  }
   0x3   : > { %p30_p1 = scmp.ge.s32.totalorder %s28_s24, 2  ;;  %p243_p2 = scmp.lt.s32.totalorder %s859_s23, 3 }
   0x5   : > { %s997_s24 = smov (%p30_p1, %s28_s24), 0  ;;  %p244_p3 = pnand %p725_p0, %p243_p2 }
   0x6   : > { %v317_v0 = vld [vmem:[%s989_s2] sm:$0xff] (!%p244_p3)  ;;  %v318_v1 = vld [vmem:[%s989_s2 + $0x8] sm:$0xff] (!%p244_p3)  ;;  %v319_v2 = vld [vmem:[%s989_s2 + $0x10] sm:$0xff] (!%p244_p3)  ;;  %p286_p4 = scmp.lt.s32.totalorder (!%p244_p3), %s851_s21, 1  ;;  %vm328_vm0 = vcmask (!%p244_p3), 261120   ;;  %vm483_vm1 = vcmask (!%p244_p3), 130048  }
   0x7   : > { %247 = sbr.rel (%p244_p3) target bundleno = 790 (0x316), region = 44  ;;  %v786_v3 = vpack.c.bf16 (!%p244_p3), %v318_v1, %v317_v0  ;;  %v320_v4 = vld [vmem:[%s989_s2 + $0x18] sm:$0xff] (!%p244_p3)  ;;  %v731_v8 = vld [vmem:[%s990_s3] ss:$0 sm:$0xff] (!%p244_p3)  ;;  %s861_s27 = smov (!%p244_p3), 32   ;;  %vm616_vm2 = vcmask (!%p244_p3), 523264  }
   0x8   : > { %v790_v5 = vpack.c.bf16 (!%p244_p3), %v320_v4, %v319_v2  ;;  %v734_v36 = vld [vmem:[%s991_s4] ss:$0 sm:$0xff] (!%p244_p3)  ;;  %s862_s28 = smov (!%p244_p3), 64   ;;  %vm619_vm3 = vcmask (!%p244_p3), 785408  }
   0x9   : > { %787 = vmatprep.subr.bf16.mxu0 (!%p244_p3), %v786_v3  ;;  %v735_v38 = vld [vmem:[%s992_s5] ss:$0 sm:$0xff] (!%p244_p3) }
   0xa   : > { %789 = vmatpush3.bf16.msra.mxu0 (!%p244_p3), %v786_v3 }
   0xb   : > { %791 = vmatprep.subr.bf16.mxu0 (!%p244_p3), %v790_v5 }
   0xe   : > { %s999_s21 = smov (!%p286_p4, %s851_s21), 1  ;;  %793 = vmatpush3.bf16.msra.mxu0 %v790_v5 }
   0xf   : > { %s746_s9 = sshll.u32 %s999_s21, 4  ;;  %s798_s15 = smul.u32 48, %s999_s21 }
  0x10   : > { %s290_s12 = scalar_lea.vmem %s987_s0, %s746_s9  ;;  %s309_s7 = scalar_lea.vmem %s993_s6, %s746_s9 }
  0x11   : > { %v315_v6 = vld [vmem:[%s290_s12] sm:$0xff]  ;;  %v316_v7 = vld [vmem:[%s290_s12 + $0x8] sm:$0xff]  ;;  %s949_s18 = scalar_lea.vmem %s988_s1, %s798_s15 }
  0x12   : > { %770 = vmatprep.mubr.msk.f32.mxu0 %vm328_vm0, %v315_v6  ;;  %v475_v19 = vld [vmem:[%s949_s18] sm:$0xff]  ;;  %v476_v59 = vld [vmem:[%s949_s18 + $0x8] sm:$0xff]  ;;  %v477_v60 = vld [vmem:[%s949_s18 + $0x10] sm:$0xff] }
  0x13   : > { %771 = vmatmul.mubr.msk.f32.vlgmr.msra.gmra.mrb[0].mxu0 %vm328_vm0, %v316_v7  ;;  %777 = vmatprep.mubr.msk.f32.mxu1 %vm483_vm1, %v475_v19  ;;  %v478_v61 = vld [vmem:[%s949_s18 + $0x18] sm:$0xff]  ;;  %v479_v62 = vld [vmem:[%s949_s18 + $0x20] sm:$0xff]  ;;  %v480_v63 = vld [vmem:[%s949_s18 + $0x28] sm:$0xff] }
  0xe6   : > { %v772_v9 = vpop.f32.mrb[0].mxu0 }
  0xe7   : > { %v401_v10 = vpop.f32.mrb[1].mxu0  ;;  %v407_v11 = vadd.f32 %v772_v9, %v731_v8 }
  0xe8   : > { %v402_v12 = vadd.f32 %v731_v8, %v401_v10 }
  0xe9   : > { %v420_v16 = vmul.f32 %v407_v11, %v407_v11  ;;  %v413_v17 = vsel %vm328_vm0, %v407_v11, 0.0 }
  0xea   : > { %v410_v13 = vsel %vm328_vm0, %v402_v12, 0.0  ;;  %v419_v14 = vmul.f32 %v402_v12, %v402_v12 }
  0xeb   : > { %411 = vadd.xlane.f32.xlu0 %v410_v13  ;;  %v424_v18 = vsel %vm328_vm0, %v420_v16, 0.0 }
  0xec   : > { %v421_v15 = vsel %vm328_vm0, %v419_v14, 0.0 }
  0xed   : > { %422 = vadd.xlane.f32.xlu1 %v421_v15 }
  0xef   : > { %414 = vadd.xlane.f32.xlu0 %v413_v17 }
  0xf1   : > { %425 = vadd.xlane.f32.xlu1 %v424_v18 }
 0x178   : > { %v412_v20 = vpop.xlane.xlu0 %411 }
 0x179   : > { %v417_v21 = vmul.f32 0.03125, %v412_v20 }
 0x17a   : > { %v423_v22 = vpop.xlane.xlu1 %422 }
 0x17b   : > { %v429_v23 = vmul.f32 %v417_v21, %v417_v21  ;;  %v427_v24 = vmul.f32 0.03125, %v423_v22  ;;  %v433_v34 = vsub.f32 %v402_v12, %v417_v21 }
 0x17c   : > { %v415_v25 = vpop.xlane.xlu0 %414 }
 0x17d   : > { %v431_v26 = vsub.f32 %v427_v24, %v429_v23  ;;  %v418_v27 = vmul.f32 0.03125, %v415_v25 }
 0x17e   : > { %v426_v28 = vpop.xlane.xlu1 %425 }
 0x17f   : > { %v435_v29 = vadd.f32 1e-05, %v431_v26  ;;  %v430_v30 = vmul.f32 %v418_v27, %v418_v27  ;;  %v428_v31 = vmul.f32 0.03125, %v426_v28  ;;  %v434_v40 = vsub.f32 %v407_v11, %v418_v27 }
 0x181   : > { %825 = vrsqrt.f32 %v435_v29  ;;  %v432_v32 = vsub.f32 %v428_v31, %v430_v30 }
 0x183   : > { %v436_v33 = vadd.f32 1e-05, %v432_v32 }
 0x185   : > { %827 = vrsqrt.f32 %v436_v33 }
 0x18b   : > { %v826_v35 = vpop.eup %825 }
 0x18c   : > { %v439_v37 = vmul.f32 %v826_v35, %v433_v34 }
 0x18e   : > { %v448_v39 = vmul.f32 %v734_v36, %v439_v37 }
 0x18f   : > { %v828_v41 = vpop.eup %827 }
 0x190   : > { %v457_v42 = vadd.f32 %v735_v38, %v448_v39  ;;  %v440_v43 = vmul.f32 %v828_v41, %v434_v40 }
 0x192   : > { %v736_v44 = vmul.f32 -1.442695, %v457_v42  ;;  %v449_v45 = vmul.f32 %v734_v36, %v440_v43 }
 0x194   : > { %829 = vpow2.f32 %v736_v44  ;;  %v458_v46 = vadd.f32 %v735_v38, %v449_v45 }
 0x196   : > { %v737_v47 = vmul.f32 -1.442695, %v458_v46 }
 0x198   : > { %831 = vpow2.f32 %v737_v47 }
 0x19e   : > { %v830_v48 = vpop.eup %829 }
 0x19f   : > { %v465_v49 = vadd.f32 1.0, %v830_v48 }
 0x1a1   : > { %833 = vrcp.f32 %v465_v49 }
 0x1a2   : > { %v832_v50 = vpop.eup %831 }
 0x1a3   : > { %v466_v51 = vadd.f32 1.0, %v832_v50 }
 0x1a5   : > { %835 = vrcp.f32 %v466_v51 }
 0x1ab   : > { %v834_v52 = vpop.eup %833 }
 0x1ac   : > { %v471_v53 = vmul.f32 %v834_v52, %v457_v42 }
 0x1ae   : > { %473 = vst.msk [vmem:[#allocation2] sm:$0xff] %vm328_vm0, %v471_v53 }
 0x1af   : > { %v836_v54 = vpop.eup %835 }
 0x1b0   : > { %v472_v55 = vmul.f32 %v836_v54, %v458_v46 }
 0x1b2   : > { %474 = vst.msk [vmem:[#allocation2 + $0x8] sm:$0xff] %vm328_vm0, %v472_v55 }
 0x1b5   : > { %v481_v56 = vld [vmem:[#allocation2] sm:$0xff] }
 0x1b9   : > { %v482_v57 = vld [vmem:[#allocation2 + $0x8] sm:$0xff] }
 0x1ba   : > { %v794_v58 = vpack.c.bf16 %v482_v57, %v481_v56 }
 0x1bc   : > { %795 = vmatprep.subr.bf16.mxu1 %v794_v58 }
 0x1bd   : > { %797 = vmatpush3.bf16.msra.mxu1 %v794_v58 }
 0x1c0   : > { %778 = vmatmul.mubr.msk.f32.vlgmr.msra.gmra.mrb[0].mxu1 %vm483_vm1, %v476_v59 }
 0x1c1   : > { %780 = vmatprep.mubr.msk.f32.mxu1 %vm483_vm1, %v477_v60 }
 0x1c4   : > { %781 = vmatmul.mubr.msk.f32.gmra.mrb[2].mxu1 %vm483_vm1, %v478_v61 }
 0x1c5   : > { %783 = vmatprep.mubr.msk.f32.mxu1 %vm483_vm1, %v479_v62 }
 0x1c8   : > { %784 = vmatmul.mubr.msk.f32.gmra.mrb[4].mxu1 %vm483_vm1, %v480_v63 }
 0x293   : > { %v779_v0 = vpop.f32.mrb[0].mxu1 }
 0x294   : > { %v568_v1 = vpop.f32.mrb[1].mxu1 }
 0x297   : > { %v782_v2 = vpop.f32.mrb[2].mxu1 }
 0x298   : > { %601 = vrot.lane.b32.xlu1 %v782_v2, %s861_s27  ;;  %v578_v3 = vpop.f32.mrb[3].mxu1 }
 0x299   : > { %599 = vrot.lane.b32.xlu0 %v578_v3, %s861_s27 }
 0x29b   : > { %v785_v4 = vpop.f32.mrb[4].mxu1 }
 0x29c   : > { %v588_v5 = vpop.f32.mrb[5].mxu1 }
 0x29d   : > { %607 = vrot.lane.b32.xlu1 %v588_v5, %s862_s28 }
 0x2a1   : > { %609 = vrot.lane.b32.xlu1 %v785_v4, %s862_s28 }
 0x30a   : > { %v602_v6 = vpop.permute.xlu1 %601 }
 0x30b   : > { %v600_v7 = vpop.permute.xlu0 %599  ;;  %v615_v11 = vsel %vm328_vm0, %v779_v0, %v602_v6 }
 0x30c   : > { %v614_v8 = vsel %vm328_vm0, %v568_v1, %v600_v7 }
 0x30f   : > { %v608_v9 = vpop.permute.xlu1 %607 }
 0x310   : > { %v617_v10 = vsel %vm616_vm2, %v614_v8, %v608_v9 }
 0x311   : > { %620 = vst.msk [vmem:[%s309_s7] sm:$0xff] %vm619_vm3, %v617_v10 }
 0x313   : > { %v610_v12 = vpop.permute.xlu1 %609 }
 0x314   : > { %v618_v13 = vsel %vm616_vm2, %v615_v11, %v610_v12 }
 0x315   : > { %621 = vst.msk [vmem:[%s309_s7 + $0x8] sm:$0xff] %vm619_vm3, %v618_v13 }
 0x316 PF: > { %s16_s23 = sadd.s32 1, %s859_s23   ;;  %s994_s21 = smov %s855_s22 }
 0x317   : > { %p13_p5 = scmp.ge.s32.totalorder %s16_s23, 4   ;;  %s995_s22 = smov %s997_s24 }
 0x319   :  { %15 = sbr.rel (!%p13_p5) target bundleno = 2 (0x2), region = 81 }

</bundles_post_ra>
